<compile_context>
chip_gen: v7x
topology: tpu7x:2x2x1
jax: 0.10.0
libtpu: 0.0.40
codegen_flags: <defaults>
</compile_context>

<pallas_src>
import functools

import numpy as np
import jax
import jax.numpy as jnp
from jax.experimental import pallas as pl
from jax.experimental.pallas import tpu as pltpu

_LANE = 128
_SIM_LANES = 128   # cosine-similarity output is lane-padded -> full-lane stores


def _round_up(x, m):
    return ((x + m - 1) // m) * m


def _pick_t_tile(t):
    """Largest MXU-friendly row tile that divides T (whole-T fallback)."""
    for tm in (256, 128):
        if t % tm == 0:
            return tm
    return t


# ----------------------------------------------------------------------------
# Fused per-branch kernel: attention (N=1 collapse) -> roll + cosine -> classifier
# ----------------------------------------------------------------------------

def _fused_branch_kernel(x_ref, xlast_ref, wf_ref, b_ref, wcls_ref,
                         attn_ref, sim_ref, logits_ref, prev_ref):
    """One (branch, T-tile) grid step.

    Block views:
      x_ref:      (1, tm, C)   f32   visual features for this tile
      xlast_ref:  (1, 1, C)    f32   last frame of the sequence (roll wrap row)
      wf_ref:     (1, C, C)    bf16  fused attention weight  W_v @ W_proj
      b_ref:      (1, 1, C)    f32   proj bias
      wcls_ref:   (1, C, Kp)   bf16  column-normalized classifier weight (K padded to 128)
      attn_ref:   (1, tm, C)   f32   attention output
      sim_ref:    (1, tm, 128) f32   cosine similarity, broadcast across lanes
      logits_ref: (1, tm, Kp)  f32   classifier logits
      prev_ref:   (1, C)       f32   scratch carry: attention output of the previous row
    """
    j = pl.program_id(1)

    x = x_ref[0].astype(jnp.bfloat16)                 # (tm, C)
    wf = wf_ref[0]                                    # (C, C)  bf16
    b = b_ref[0]                                      # (1, C)  f32

    # Attention with a single token (N == 1): softmax of the 1x1 score is exactly 1,
    # so  attn @ v == v  and the whole module collapses to  x @ (W_v @ W_proj) + b.
    attn = jnp.dot(x, wf, preferred_element_type=jnp.float32) + b      # (tm, C) f32

    # Row feeding roll(1, 0) at the tile boundary.  For the first tile it is the attention
    # output of the *last* frame (torch.roll wrap-around); afterwards it is the last row of
    # the previous tile, carried in VMEM scratch across the (sequential) T-tile grid axis.
    @pl.when(j == 0)
    def _():
        prev_ref[...] = jnp.dot(xlast_ref[0].astype(jnp.bfloat16), wf,
                                preferred_element_type=jnp.float32) + b

    prev = prev_ref[...]                              # (1, C)
    rolled = pltpu.roll(attn, 1, axis=0)              # row i <- row i-1 (row 0 <- row tm-1)
    row0 = jax.lax.broadcasted_iota(jnp.int32, attn.shape, 0) == 0
    rolled = jnp.where(row0, jnp.broadcast_to(prev, attn.shape), rolled)
    prev_ref[...] = attn[-1:, :]                      # carry for the next tile

    # Cosine similarity along C (torch: dot / max(||a||*||b||, eps), eps = 1e-6).
    dotp = jnp.sum(attn * rolled, axis=-1, keepdims=True)
    na = jnp.sqrt(jnp.sum(attn * attn, axis=-1, keepdims=True))
    nb = jnp.sqrt(jnp.sum(rolled * rolled, axis=-1, keepdims=True))
    sim = dotp / jnp.maximum(na * nb, 1e-6)           # (tm, 1)

    attn_ref[0] = attn
    sim_ref[0] = jnp.broadcast_to(sim, (sim.shape[0], _SIM_LANES))   # lane-dense store
    # Classifier on the visual features.
    # TODO(synk): BiLSTMLayer temporal_model[i] is an external module (not provided);
    #             the NormLinear classifier is applied to the visual features directly.
    logits_ref[0] = jnp.dot(x, wcls_ref[0], preferred_element_type=jnp.float32)


def fused_slr_branches(x_all, x_last, w_attn_fused, b_proj, w_cls_norm, *, tm):
    """x_all: (3, T, C) f32;  x_last: (3, 1, C) f32; w_attn_fused: (3, C, C) bf16;
       b_proj: (3, 1, C) f32;  w_cls_norm: (3, C, Kp) bf16.
       Returns (attn (3,T,C) f32, sim (3,T,128) f32, logits (3,T,Kp) f32)."""
    nbr, T, C = x_all.shape
    Kp = w_cls_norm.shape[-1]
    assert T % tm == 0
    nt = T // tm
    return pl.pallas_call(
        _fused_branch_kernel,
        out_shape=(
            jax.ShapeDtypeStruct((nbr, T, C), jnp.float32),
            jax.ShapeDtypeStruct((nbr, T, _SIM_LANES), jnp.float32),
            jax.ShapeDtypeStruct((nbr, T, Kp), jnp.float32),
        ),
        grid=(nbr, nt),
        in_specs=[
            pl.BlockSpec((1, tm, C), lambda f, j: (f, j, 0)),       # x tile
            pl.BlockSpec((1, 1, C), lambda f, j: (f, 0, 0)),        # last frame (roll wrap)
            pl.BlockSpec((1, C, C), lambda f, j: (f, 0, 0)),        # fused attn weight (bf16)
            pl.BlockSpec((1, 1, C), lambda f, j: (f, 0, 0)),        # proj bias
            pl.BlockSpec((1, C, Kp), lambda f, j: (f, 0, 0)),       # normalized classifier (bf16)
        ],
        out_specs=(
            pl.BlockSpec((1, tm, C), lambda f, j: (f, j, 0)),
            pl.BlockSpec((1, tm, _SIM_LANES), lambda f, j: (f, j, 0)),
            pl.BlockSpec((1, tm, Kp), lambda f, j: (f, j, 0)),
        ),
        scratch_shapes=[pltpu.VMEM((1, C), jnp.float32)],
        compiler_params=pltpu.CompilerParams(
            # branch axis is independent (megacore-shardable on v7x); the T axis carries the
            # roll boundary through scratch, so it must stay sequential -> "arbitrary".
            dimension_semantics=("parallel", "arbitrary"),
            vmem_limit_bytes=32 * 1024 * 1024,
        ),
    )(x_all, x_last, w_attn_fused, b_proj, w_cls_norm)


# ----------------------------------------------------------------------------
# Device-side top-k segment mean pooling (replaces the host loop)
# ----------------------------------------------------------------------------

def _segment_mean_pool(feat, sim, k_top, T):
    """Device replica of the torch top-k / segment / avg_pool1d loop.
    feat: (T, C) f32; sim: (T,) f32; k_top static int -> (k_top, C)."""
    _, topk_idx = jax.lax.top_k(sim, k_top)
    idx = jnp.sort(topk_idx).astype(jnp.int32)            # sorted by frame index (as in torch)
    if k_top == 1:
        starts = jnp.zeros((1,), jnp.int32)
        ends = idx
    else:
        starts = jnp.concatenate(
            [jnp.zeros((1,), jnp.int32), idx[:k_top - 2], idx[k_top - 1:]])
        ends = jnp.concatenate([idx[:k_top - 1], jnp.full((1,), T - 1, jnp.int32)])
    # mean over rows [start, end) via cumulative sum; row [start] when end == start.
    csum = jnp.concatenate(
        [jnp.zeros((1, feat.shape[1]), feat.dtype), jnp.cumsum(feat, axis=0)], axis=0)
    seg_sum = csum[ends] - csum[starts]
    seg_len = (ends - starts).astype(feat.dtype)
    seg_mean = seg_sum / jnp.maximum(seg_len, 1.0)[:, None]
    return jnp.where((ends > starts)[:, None], seg_mean, feat[starts])


# ----------------------------------------------------------------------------
# SLRModel forward (fused Pallas kernel + on-device glue)
# ----------------------------------------------------------------------------

@functools.partial(jax.jit, static_argnames=("k_top", "num_classes"))
def _slr_forward_device(visual_feats, len_x, w_attn_fused, b_proj, w_cls_norm,
                        *, k_top, num_classes):
    x_all = jnp.stack([f[:, 0, :] for f in visual_feats], axis=0).astype(jnp.float32)
    nbr, T, C = x_all.shape
    x_last = x_all[:, T - 1:T, :]

    attn_all, sim_all, logits_all = fused_slr_branches(
        x_all, x_last, w_attn_fused, b_proj, w_cls_norm, tm=_pick_t_tile(T))
    sim = sim_all[:, :, 0]                                 # (3, T)

    pooled_features = [_segment_mean_pool(attn_all[i], sim[i], k_top, T)
                       for i in range(nbr)]
    sequence_logits = [logits_all[i, :, :num_classes][:, None, :] for i in range(nbr)]

    # TODO(synk): conv_logits / gloss_encoder / beam decoder are external modules.
    return {
        "feat_len": len_x,
        "conv_logits": None,
        "sequence_logits": sequence_logits,
        "conv_sents": None,
        "recognized_sents": None,
        "pooled_features": pooled_features,
        "gloss_feature": None,
        "label": None,
        # extra diagnostics (already produced by the kernel; also used by the pooling)
        "attn_features": attn_all,
        "similarity": sim,
    }


def slr_forward(visual_feats, len_x, label_lgt, prepared):
    """visual_feats: list of 3 arrays (T, 1, C) -- stands in for conv1d_outputs['visual_feat'].
    TODO(synk): the slowfast conv2d backbone and TemporalSlowFastFuse conv1d are external."""
    for f in visual_feats:
        assert f.ndim == 3 and f.shape[1] == 1, \
            "SLRModel pooled-feature branch (and the N=1 softmax collapse) assumes batch size 1"
    k_top = int(np.asarray(label_lgt)[0])
    # TODO(synk): real feat_len comes from the conv1d temporal downsampling.
    return _slr_forward_device(
        tuple(visual_feats), jnp.asarray(len_x),
        prepared["w_attn_fused"], prepared["b_proj"], prepared["w_cls_norm"],
        k_top=k_top, num_classes=prepared["num_classes"])


# ----------------------------------------------------------------------------
# Parameter construction (synthetic; shapes from SLRModel.__init__) + preprocessing
# ----------------------------------------------------------------------------

def init_params(key, hidden, num_classes):
    params = {"attn_wqkv": [], "attn_wproj": [], "attn_bproj": [], "cls_w": []}
    keys = jax.random.split(key, 12)
    gain = np.sqrt(2.0)                                   # calculate_gain('relu')
    for i in range(3):
        k0, k1, k2, k3 = keys[4 * i:4 * i + 4]
        lim = 1.0 / np.sqrt(hidden)
        params["attn_wqkv"].append(
            jax.random.uniform(k0, (hidden, 3 * hidden), jnp.float32, -lim, lim))
        params["attn_wproj"].append(
            jax.random.uniform(k1, (hidden, hidden), jnp.float32, -lim, lim))
        params["attn_bproj"].append(
            jax.random.uniform(k2, (1, hidden), jnp.float32, -lim, lim))
        lim_cls = gain * np.sqrt(6.0 / (hidden + num_classes))   # xavier_uniform
        params["cls_w"].append(
            jax.random.uniform(k3, (hidden, num_classes), jnp.float32, -lim_cls, lim_cls))
    return params


def prepare_params(params, hidden, num_classes):
    """One-time weight preprocessing (outside the per-forward hot path):
       * fuse W_v @ W_proj (N=1 attention collapse),
       * column-normalize the NormLinear weight (F.normalize(W, dim=0)),
       * zero-pad the class dim to a multiple of 128 (lane-dense stores),
       * cast weights to bf16 (kernel accumulates in f32)."""
    C, K = hidden, num_classes
    Kp = _round_up(K, _LANE)
    w_fused, w_cls, biases = [], [], []
    for i in range(3):
        w_v = params["attn_wqkv"][i][:, 2 * C:3 * C]                  # (C, C)
        w_fused.append(jnp.dot(w_v, params["attn_wproj"][i]).astype(jnp.bfloat16))
        biases.append(params["attn_bproj"][i].astype(jnp.float32))
        w = params["cls_w"][i]
        wn = w / jnp.maximum(jnp.sqrt(jnp.sum(w * w, axis=0, keepdims=True)), 1e-12)
        w_cls.append(jnp.pad(wn, ((0, 0), (0, Kp - K))).astype(jnp.bfloat16))
    return {
        "w_attn_fused": jnp.stack(w_fused, axis=0),       # (3, C, C)  bf16
        "b_proj": jnp.stack(biases, axis=0),              # (3, 1, C)  f32
        "w_cls_norm": jnp.stack(w_cls, axis=0),           # (3, C, Kp) bf16
        "num_classes": K,
    }


def _attention_reference(x, w_qkv, w_proj, b_proj):
    """Plain-JAX replica of the torch Attention module (num_heads=1, eval mode)."""
    B, N, C = x.shape
    qkv = jnp.einsum("bnc,cd->bnd", x, w_qkv)
    q, k, v = qkv[..., :C], qkv[..., C:2 * C], qkv[..., 2 * C:]
    attn = jax.nn.softmax(jnp.einsum("bnc,bmc->bnm", q, k) * (C ** -0.5), axis=-1)
    out = jnp.einsum("bnm,bmc->bnc", attn, v)
    return jnp.einsum("bnc,cd->bnd", out, w_proj) + b_proj


# ----------------------------------------------------------------------------
# Main
# ----------------------------------------------------------------------------

if __name__ == "__main__":
    T, B, C, K = 16, 1, 128, 16      # small stand-ins for (seq, batch, hidden=1024, classes)
    key = jax.random.PRNGKey(0)
    kp, kf0, kf1, kf2 = jax.random.split(key, 4)

    params = init_params(kp, C, K)
    prepared = prepare_params(params, C, K)
    visual_feats = [
        jax.random.normal(kf0, (T, B, C), jnp.float32),
        jax.random.normal(kf1, (T, B, C), jnp.float32),
        jax.random.normal(kf2, (T, B, C), jnp.float32),
    ]
    len_x = np.array([T], dtype=np.int32)
    label_lgt = np.array([4], dtype=np.int32)
    k_top = int(label_lgt[0])

    out = slr_forward(visual_feats, len_x, label_lgt, prepared)
    jax.block_until_ready(out)

    # ---- shape checks ----
    for pf in out["pooled_features"]:
        assert pf.shape == (k_top, C)
    for sl in out["sequence_logits"]:
        assert sl.shape == (T, B, K)

    # ---- numerical sanity checks vs. a plain-JAX replica of the original math ----
    attn_all = np.asarray(out["attn_features"])           # (3, T, C)
    sim_all = np.asarray(out["similarity"])               # (3, T)
    for i in range(3):
        ref_attn = np.asarray(_attention_reference(
            visual_feats[i], params["attn_wqkv"][i],
            params["attn_wproj"][i], params["attn_bproj"][i])[:, 0, :])
        np.testing.assert_allclose(attn_all[i], ref_attn, rtol=3e-2, atol=3e-2)

        rolled = np.roll(ref_attn, 1, axis=0)
        ref_sim = (ref_attn * rolled).sum(-1) / np.maximum(
            np.linalg.norm(ref_attn, axis=-1) * np.linalg.norm(rolled, axis=-1), 1e-6)
        np.testing.assert_allclose(sim_all[i], ref_sim, atol=1e-1)

        w = np.asarray(params["cls_w"][i])
        wn = w / np.maximum(np.linalg.norm(w, axis=0, keepdims=True), 1e-12)
        ref_logits = np.asarray(visual_feats[i][:, 0, :]) @ wn
        np.testing.assert_allclose(np.asarray(out["sequence_logits"][i][:, 0, :]),
                                   ref_logits, rtol=3e-2, atol=3e-2)

        # segment mean-pooling replica of the torch loop (uses the kernel's own outputs)
        idx = np.sort(np.asarray(jax.lax.top_k(jnp.asarray(sim_all[i]), k_top)[1]))
        se = []
        for j in range(k_top):
            if j == 0:
                se.append((0, int(idx[0])))
            elif j == k_top - 1:
                se.append((int(idx[-1]), T - 1))
            else:
                se.append((int(idx[j - 1]), int(idx[j])))
        ref_pool = np.stack([attn_all[i, s:e].mean(0) if e != s else attn_all[i, s]
                             for s, e in se])
        np.testing.assert_allclose(np.asarray(out["pooled_features"][i]), ref_pool,
                                   rtol=1e-4, atol=1e-4)

    print("KERNEL_OK")
</pallas_src>

<mosaic_0001>
module attributes {stable_mosaic.version = 11 : i64} {
  func.func @_fused_branch_kernel(%arg0: i32, %arg1: i32, %arg2: memref<1x16x128xf32, #tpu.memory_space<vmem>>, %arg3: memref<1x1x128xf32, #tpu.memory_space<vmem>>, %arg4: memref<1x128x128xbf16, #tpu.memory_space<vmem>>, %arg5: memref<1x1x128xf32, #tpu.memory_space<vmem>>, %arg6: memref<1x128x128xbf16, #tpu.memory_space<vmem>>, %arg7: memref<1x16x128xf32, #tpu.memory_space<vmem>>, %arg8: memref<1x16x128xf32, #tpu.memory_space<vmem>>, %arg9: memref<1x16x128xf32, #tpu.memory_space<vmem>>, %arg10: memref<1x128xf32, #tpu.memory_space<vmem>>) attributes {dimension_semantics = [#tpu.dimension_semantics<parallel>, #tpu.dimension_semantics<arbitrary>], iteration_bounds = array<i64: 3, 1>, scalar_prefetch = 0 : i64, scratch_operands = 1 : i64, tpu.core_type = #tpu.core_type<tc>, window_params = [{transform_indices = @transform_0, window_bounds = array<i64: 1, 16, 128>}, {transform_indices = @transform_1, window_bounds = array<i64: 1, 1, 128>}, {transform_indices = @transform_2, window_bounds = array<i64: 1, 128, 128>}, {transform_indices = @transform_3, window_bounds = array<i64: 1, 1, 128>}, {transform_indices = @transform_4, window_bounds = array<i64: 1, 128, 128>}, {transform_indices = @transform_5, window_bounds = array<i64: 1, 16, 128>}, {transform_indices = @transform_6, window_bounds = array<i64: 1, 16, 128>}, {transform_indices = @transform_7, window_bounds = array<i64: 1, 16, 128>}]} {
    %c0 = arith.constant 0 : index
    %c0_0 = arith.constant 0 : index
    %c0_1 = arith.constant 0 : index
    %0 = vector.load %arg2[%c0, %c0_0, %c0_1] : memref<1x16x128xf32, #tpu.memory_space<vmem>>, vector<1x16x128xf32>
    %1 = vector.shape_cast %0 : vector<1x16x128xf32> to vector<16x128xf32>
    %2 = arith.truncf %1 : vector<16x128xf32> to vector<16x128xbf16>
    %c0_2 = arith.constant 0 : index
    %c0_3 = arith.constant 0 : index
    %c0_4 = arith.constant 0 : index
    %3 = vector.load %arg4[%c0_2, %c0_3, %c0_4] : memref<1x128x128xbf16, #tpu.memory_space<vmem>>, vector<1x128x128xbf16>
    %4 = vector.shape_cast %3 : vector<1x128x128xbf16> to vector<128x128xbf16>
    %c0_5 = arith.constant 0 : index
    %c0_6 = arith.constant 0 : index
    %c0_7 = arith.constant 0 : index
    %5 = vector.load %arg5[%c0_5, %c0_6, %c0_7] : memref<1x1x128xf32, #tpu.memory_space<vmem>>, vector<1x1x128xf32>
    %6 = vector.shape_cast %5 : vector<1x1x128xf32> to vector<1x128xf32>
    %cst = arith.constant dense<0.000000e+00> : vector<16x128xf32>
    %7 = tpu.matmul %2, %4, %cst {dimension_numbers = #tpu.dot_dimension_numbers<[1], [0], [0], [1], [0, 0, 1, 1], [], []>} : vector<16x128xbf16>, vector<128x128xbf16>, vector<16x128xf32> -> vector<16x128xf32>
    %8 = vector.broadcast %6 : vector<1x128xf32> to vector<16x128xf32>
    %9 = arith.addf %7, %8 : vector<16x128xf32>
    %c0_i32 = arith.constant 0 : i32
    %10 = arith.cmpi eq, %arg1, %c0_i32 : i32
    %11 = arith.extui %10 : i1 to i32
    %c0_i32_8 = arith.constant 0 : i32
    %12 = arith.cmpi ne, %11, %c0_i32_8 : i32
    scf.if %12 {
      %c0_31 = arith.constant 0 : index
      %c0_32 = arith.constant 0 : index
      %c0_33 = arith.constant 0 : index
      %52 = vector.load %arg3[%c0_31, %c0_32, %c0_33] : memref<1x1x128xf32, #tpu.memory_space<vmem>>, vector<1x1x128xf32>
      %53 = vector.shape_cast %52 : vector<1x1x128xf32> to vector<1x128xf32>
      %54 = arith.truncf %53 : vector<1x128xf32> to vector<1x128xbf16>
      %cst_34 = arith.constant dense<0.000000e+00> : vector<1x128xf32>
      %55 = tpu.matmul %54, %4, %cst_34 {dimension_numbers = #tpu.dot_dimension_numbers<[1], [0], [0], [1], [0, 0, 1, 1], [], []>} : vector<1x128xbf16>, vector<128x128xbf16>, vector<1x128xf32> -> vector<1x128xf32>
      %56 = arith.addf %55, %6 : vector<1x128xf32>
      %c0_35 = arith.constant 0 : index
      %c0_36 = arith.constant 0 : index
      %57 = vector.load %arg10[%c0_35, %c0_36] : memref<1x128xf32, #tpu.memory_space<vmem>>, vector<1x128xf32>
      tpu.vector_store %arg10[%c0_35, %c0_36], %56 {strides = array<i32>} : memref<1x128xf32, #tpu.memory_space<vmem>>, vector<1x128xf32>,
    } else {
    }
    %c0_9 = arith.constant 0 : index
    %c0_10 = arith.constant 0 : index
    %13 = vector.load %arg10[%c0_9, %c0_10] : memref<1x128xf32, #tpu.memory_space<vmem>>, vector<1x128xf32>
    %c1_i32 = arith.constant 1 : i32
    %14 = tpu.dynamic_rotate %9 by %c1_i32 dim 0 : vector<16x128xf32>, i32 -> vector<16x128xf32>
    %15 = tpu.iota {dimensions = array<i32: 0>} : vector<16x128xi32>
    %c0_i32_11 = arith.constant 0 : i32
    %16 = vector.broadcast %c0_i32_11 : i32 to vector<16x128xi32>
    %17 = arith.cmpi eq, %15, %16 : vector<16x128xi32>
    %18 = vector.shape_cast %13 : vector<1x128xf32> to vector<1x128xf32>
    %19 = vector.broadcast %18 : vector<1x128xf32> to vector<16x128xf32>
    %20 = arith.select %17, %19, %14 : vector<16x128xi1>, vector<16x128xf32>
    %21 = vector.extract_strided_slice %9 {offsets = [15, 0], sizes = [1, 128], strides = [1, 1]} : vector<16x128xf32> to vector<1x128xf32>
    %c0_12 = arith.constant 0 : index
    %c0_13 = arith.constant 0 : index
    %22 = vector.load %arg10[%c0_12, %c0_13] : memref<1x128xf32, #tpu.memory_space<vmem>>, vector<1x128xf32>
    tpu.vector_store %arg10[%c0_12, %c0_13], %21 {strides = array<i32>} : memref<1x128xf32, #tpu.memory_space<vmem>>, vector<1x128xf32>,
    %23 = arith.mulf %9, %20 : vector<16x128xf32>
    %cst_14 = arith.constant dense<0.000000e+00> : vector<16xf32>
    %24 = vector.multi_reduction <add>, %23, %cst_14 [1] : vector<16x128xf32> to vector<16xf32>
    %25 = vector.shape_cast %24 : vector<16xf32> to vector<16x1xf32>
    %26 = arith.mulf %9, %9 : vector<16x128xf32>
    %cst_15 = arith.constant dense<0.000000e+00> : vector<16xf32>
    %27 = vector.multi_reduction <add>, %26, %cst_15 [1] : vector<16x128xf32> to vector<16xf32>
    %28 = vector.shape_cast %27 : vector<16xf32> to vector<16x1xf32>
    %29 = math.sqrt %28 : vector<16x1xf32>
    %30 = arith.mulf %20, %20 : vector<16x128xf32>
    %cst_16 = arith.constant dense<0.000000e+00> : vector<16xf32>
    %31 = vector.multi_reduction <add>, %30, %cst_16 [1] : vector<16x128xf32> to vector<16xf32>
    %32 = vector.shape_cast %31 : vector<16xf32> to vector<16x1xf32>
    %33 = math.sqrt %32 : vector<16x1xf32>
    %34 = arith.mulf %29, %33 : vector<16x1xf32>
    %cst_17 = arith.constant 9.99999997E-7 : f32
    %35 = vector.broadcast %cst_17 : f32 to vector<16x1xf32>
    %36 = arith.maximumf %34, %35 : vector<16x1xf32>
    %37 = arith.divf %25, %36 : vector<16x1xf32>
    %c0_18 = arith.constant 0 : index
    %c0_19 = arith.constant 0 : index
    %c0_20 = arith.constant 0 : index
    %38 = vector.load %arg7[%c0_18, %c0_19, %c0_20] : memref<1x16x128xf32, #tpu.memory_space<vmem>>, vector<1x16x128xf32>
    %39 = vector.shape_cast %38 : vector<1x16x128xf32> to vector<16x128xf32>
    %40 = vector.shape_cast %9 : vector<16x128xf32> to vector<1x16x128xf32>
    tpu.vector_store %arg7[%c0_18, %c0_19, %c0_20], %40 {strides = array<i32>} : memref<1x16x128xf32, #tpu.memory_space<vmem>>, vector<1x16x128xf32>,
    %41 = vector.shape_cast %37 : vector<16x1xf32> to vector<16x1xf32>
    %42 = vector.broadcast %41 : vector<16x1xf32> to vector<16x128xf32>
    %c0_21 = arith.constant 0 : index
    %c0_22 = arith.constant 0 : index
    %c0_23 = arith.constant 0 : index
    %43 = vector.load %arg8[%c0_21, %c0_22, %c0_23] : memref<1x16x128xf32, #tpu.memory_space<vmem>>, vector<1x16x128xf32>
    %44 = vector.shape_cast %43 : vector<1x16x128xf32> to vector<16x128xf32>
    %45 = vector.shape_cast %42 : vector<16x128xf32> to vector<1x16x128xf32>
    tpu.vector_store %arg8[%c0_21, %c0_22, %c0_23], %45 {strides = array<i32>} : memref<1x16x128xf32, #tpu.memory_space<vmem>>, vector<1x16x128xf32>,
    %c0_24 = arith.constant 0 : index
    %c0_25 = arith.constant 0 : index
    %c0_26 = arith.constant 0 : index
    %46 = vector.load %arg6[%c0_24, %c0_25, %c0_26] : memref<1x128x128xbf16, #tpu.memory_space<vmem>>, vector<1x128x128xbf16>
    %47 = vector.shape_cast %46 : vector<1x128x128xbf16> to vector<128x128xbf16>
    %cst_27 = arith.constant dense<0.000000e+00> : vector<16x128xf32>
    %48 = tpu.matmul %2, %47, %cst_27 {dimension_numbers = #tpu.dot_dimension_numbers<[1], [0], [0], [1], [0, 0, 1, 1], [], []>} : vector<16x128xbf16>, vector<128x128xbf16>, vector<16x128xf32> -> vector<16x128xf32>
    %c0_28 = arith.constant 0 : index
    %c0_29 = arith.constant 0 : index
    %c0_30 = arith.constant 0 : index
    %49 = vector.load %arg9[%c0_28, %c0_29, %c0_30] : memref<1x16x128xf32, #tpu.memory_space<vmem>>, vector<1x16x128xf32>
    %50 = vector.shape_cast %49 : vector<1x16x128xf32> to vector<16x128xf32>
    %51 = vector.shape_cast %48 : vector<16x128xf32> to vector<1x16x128xf32>
    tpu.vector_store %arg9[%c0_28, %c0_29, %c0_30], %51 {strides = array<i32>} : memref<1x16x128xf32, #tpu.memory_space<vmem>>, vector<1x16x128xf32>,
    return
  }
  func.func @transform_0(%arg0: i32, %arg1: i32) -> (i32, i32, i32) {
    %c0_i32 = arith.constant 0 : i32
    %c0_i32_0 = arith.constant 0 : i32
    return %arg0, %arg1, %c0_i32 : i32, i32, i32
  }
  func.func @transform_1(%arg0: i32, %arg1: i32) -> (i32, i32, i32) {
    %c0_i32 = arith.constant 0 : i32
    %c0_i32_0 = arith.constant 0 : i32
    %c0_i32_1 = arith.constant 0 : i32
    return %arg0, %c0_i32, %c0_i32_0 : i32, i32, i32
  }
  func.func @transform_2(%arg0: i32, %arg1: i32) -> (i32, i32, i32) {
    %c0_i32 = arith.constant 0 : i32
    %c0_i32_0 = arith.constant 0 : i32
    %c0_i32_1 = arith.constant 0 : i32
    return %arg0, %c0_i32, %c0_i32_0 : i32, i32, i32
  }
  func.func @transform_3(%arg0: i32, %arg1: i32) -> (i32, i32, i32) {
    %c0_i32 = arith.constant 0 : i32
    %c0_i32_0 = arith.constant 0 : i32
    %c0_i32_1 = arith.constant 0 : i32
    return %arg0, %c0_i32, %c0_i32_0 : i32, i32, i32
  }
  func.func @transform_4(%arg0: i32, %arg1: i32) -> (i32, i32, i32) {
    %c0_i32 = arith.constant 0 : i32
    %c0_i32_0 = arith.constant 0 : i32
    %c0_i32_1 = arith.constant 0 : i32
    return %arg0, %c0_i32, %c0_i32_0 : i32, i32, i32
  }
  func.func @transform_5(%arg0: i32, %arg1: i32) -> (i32, i32, i32) {
    %c0_i32 = arith.constant 0 : i32
    %c0_i32_0 = arith.constant 0 : i32
    return %arg0, %arg1, %c0_i32 : i32, i32, i32
  }
  func.func @transform_6(%arg0: i32, %arg1: i32) -> (i32, i32, i32) {
    %c0_i32 = arith.constant 0 : i32
    %c0_i32_0 = arith.constant 0 : i32
    return %arg0, %arg1, %c0_i32 : i32, i32, i32
  }
  func.func @transform_7(%arg0: i32, %arg1: i32) -> (i32, i32, i32) {
    %c0_i32 = arith.constant 0 : i32
    %c0_i32_0 = arith.constant 0 : i32
    return %arg0, %arg1, %c0_i32 : i32, i32, i32
  }
}

</mosaic_0001>

<bundles_post_ra>
// kernel: _slr_forward_device.1
= control target key start
LH: loop header
LB: loop body
LE: loop exit
PB: predicated region body
PF: predicated region fallthrough
CT: control target
= control target key end

     0   :  { %13 = vsyncpa [#allocation4], 0  ;;  %s1719_s0 = inlined_call_operand.vmem [shape: f32[3,16,128], index: 0, kind: input, shape index: {}]   ;;  %s1720_s1 = inlined_call_operand.vmem [shape: f32[3,1,128], index: 1, kind: input, shape index: {}]   ;;  %s1721_s2 = inlined_call_operand.hbm [shape: bf16[3,128,128], index: 2, kind: input, shape index: {}]   ;;  %s1722_s3 = inlined_call_operand.vmem [shape: f32[3,1,128], index: 3, kind: input, shape index: {}]   ;;  %s1723_s4 = inlined_call_operand.hbm [shape: bf16[3,128,128], index: 4, kind: input, shape index: {}]   ;;  %s1724_s5 = inlined_call_operand.vmem [shape: f32[3,16,128], index: 5, kind: output, shape index: {0}]   ;;  %s1725_s6 = inlined_call_operand.vmem [shape: f32[3,16,128], index: 6, kind: output, shape index: {1}]   ;;  %s1726_s7 = inlined_call_operand.vmem [shape: f32[3,16,128], index: 7, kind: output, shape index: {2}]  }
   0x1   :  { %15 = vsyncpa [#allocation4 + $0x1], 0 }
   0x2   :  { %16 = vsyncpa [#allocation6], 0 }
   0x3   :  { %18 = vsyncpa [#allocation6 + $0x1], 0  ;;  %s1459_s24 = smov 0   ;;  %s1461_s25 = smov 0  }
   0x4   :  { %s1463_s26 = smov 0   ;;  %s1465_s27 = smov 0  }
   0x5   :  { %s1467_s28 = smov 0   ;;  %s1469_s29 = smov 0  }
   0x6 LB: > { %s1072_s30 = sadd.s32 4294967295, %s1411_s29   ;;  %s36_s8 = sadd.s32 1, %s1407_s28  ;;  %s1411_s29 = sphi %s1469_s29, %s24_s29   ;;  %s1407_s28 = sphi %s1467_s28, %s1739_s28   ;;  %s1403_s27 = sphi %s1465_s27, %s1738_s27   ;;  %s1399_s26 = sphi %s1463_s26, %s1737_s26   ;;  %s1395_s25 = sphi %s1461_s25, %s1736_s25   ;;  %s1391_s24 = sphi %s1459_s24, %s1735_s24  }
   0x7   : > { %p38_p0 = scmp.ge.s32.totalorder %s36_s8, 3  ;;  %s97_s9 = sadd.s32 1, %s1399_s26 }
   0x8   : > { %p104_p1 = scmp.ne.s32.totalorder %s1399_s26, %s1395_s25  ;;  %p105_p2 = scmp.eq.s32.totalorder %s1411_s29, 0 }
   0x9   : > { %s1741_s8 = smov (%p38_p0, %s36_s8), 0  ;;  %p110_p4 = scmp.ne.s32.totalorder %s1395_s25, %s1391_s24 }
   0xa   : > { %p1495_p3 = por %p105_p2, %p104_p1  ;;  %s94_s11 = ssub.s32 %s1407_s28, %s1741_s8 }
   0xb   : > { %p111_p5 = scmp.eq.s32.totalorder %s1072_s30, 0  ;;  %p95_p6 = scmp.eq.s32.totalorder %s94_s11, 0 }
   0xc   : > { %p1216_p8 = scmp.lt.s32.totalorder %s1411_s29, 3  ;;  %s1511_s14 = sand.u32 1, %s1399_s26  }
   0xd   : > { %p1502_p7 = por %p111_p5, %p110_p4  ;;  %s1112_s15 = sshll.u32 %s1407_s28, 10 }
   0xe   : > { %s1508_s13 = scalar_select %p95_p6, %s1399_s26, %s97_s9  }
   0xf   : > { %s1730_s12 = scalar_select %p1502_p7, 1, 0 }
  0x10   : > { %s1076_s16 = sshll.u32 %s1511_s14, 6  ;;  %s1520_s19 = scalar_lea.hbm %s1721_s2, %s1112_s15 }
  0x11   : > { %s293_s20 = scalar_lea.vmem [#allocation3], %s1076_s16  ;;  %p1526_p9 = pnand %p1216_p8, %p1495_p3 }
  0x12   : > { %s300_s21 = sshll.u32 %s293_s20, 4  ;;  %s290_s23 = scalar_lea.sflag [#allocation4], %s1511_s14  ;;  %s1530_s21 = int_to_ptr.vmem [resolvable:$true] %s300_s21 }
  0x13   : > { %s1297_s24 = scalar_lea.hbm %s1520_s19, 1024  ;;  %p1299_p11 = pneg %p1526_p9 }
  0x14   : > { %p1298_p10 = scmp.ne.s32.totalorder %s1520_s19, %s1297_s24  ;;  %s1302_s10 = scalar_lea.hbm %s1721_s2, 3072 }
  0x15   : > { %p1303_p0 = scmp.lt.u32.totalorder %s1520_s19, %s1721_s2  ;;  %p1304_p1 = scmp.lt.u32.totalorder %s1302_s10, %s1297_s24 }
  0x16   : > { %p1300_p12 = pnand %p1299_p11, %p1298_p10  ;;  %p1306_p3 = scmp.lt.u32.totalorder %s1297_s24, %s1520_s19 }
  0x17   : > { %p1305_p2 = por %p1304_p1, %p1303_p0 }
  0x18   : > { %p1301_p13 = pneg %p1300_p12 }
  0x19   : > { %p1307_p4 = por %p1306_p3, %p1305_p2 }
  0x1b   : > { %p1308_p5 = pnand %p1307_p4, %p1301_p13 }
  0x1d   : > { %1311 = shalt.err (!%p1308_p5)
}
  0x1e   : > { %s1312_s18 = scalar_lea.vmem %s1530_s21, 1024  ;;  %s1413_s20 = smov [#allocation3]  }
  0x1f   : > { %p1313_p6 = scmp.ne.s32.totalorder %s1530_s21, %s1312_s18  ;;  %s1317_s30 = sshll.u32 %s1413_s20, 4  ;;  %s1318_s30 = int_to_ptr.vmem [resolvable:$false] %s1317_s30 }
  0x20   : > { %s1319_s9 = scalar_lea.vmem %s1318_s30, 2048  ;;  %p1320_p12 = scmp.lt.s32.totalorder %s1530_s21, %s1318_s30 }
  0x21   : > { %p1315_p8 = pnand %p1313_p6, %p1299_p11  ;;  %p1321_p0 = scmp.lt.s32.totalorder %s1319_s9, %s1312_s18 }
  0x23   : > { %p1316_p10 = pneg %p1315_p8  ;;  %p1322_p1 = por %p1321_p0, %p1320_p12 }
  0x25   : > { %p1323_p2 = pnand %p1322_p1, %p1316_p10 }
  0x27   : > { %1326 = shalt.err (!%p1323_p2)
}
  0x28   : > { %s1727_s24 = smov 64   ;;  %s1415_s10 = smov 4  }
  0x29   : > { %1212 = dma.hbm_to_vmem [thread:$0]  (!%p1526_p9), %s1520_s19, 1024, %s1530_s21, %s290_s23, %s1727_s24, %s1727_s24, %s1415_s10  }
  0x2a   : > { %p1082_p13 = scmp.ge.s32.totalorder %s1411_s29, 1  ;;  %p335_p3 = scmp.lt.s32.totalorder %s1411_s29, 4 }
  0x2b   : > { %s1574_s20 = scalar_lea.hbm %s1723_s4, %s1112_s15  ;;  %s320_s30 = scalar_lea.vmem [#allocation5], %s1076_s16 }
  0x2c   : > { %p1565_p4 = pnand %p1082_p13, %p335_p3  ;;  %s327_s9 = sshll.u32 %s320_s30, 4  ;;  %s1578_s9 = int_to_ptr.vmem [resolvable:$true] %s327_s9 }
  0x2d   : > { %s317_s19 = scalar_lea.sflag [#allocation6], %s1511_s14  ;;  %s1327_s21 = scalar_lea.hbm %s1574_s20, 1024 }
  0x2e   : > { %p1328_p5 = scmp.ne.s32.totalorder %s1574_s20, %s1327_s21  ;;  %s1332_s15 = scalar_lea.hbm %s1723_s4, 3072 }
  0x2f   : > { %p1333_p10 = scmp.lt.u32.totalorder %s1574_s20, %s1723_s4  ;;  %p1334_p12 = scmp.lt.u32.totalorder %s1332_s15, %s1327_s21 }
  0x30   : > { %p1330_p6 = pnand %p1328_p5, %p1299_p11  ;;  %p1336_p1 = scmp.lt.u32.totalorder %s1327_s21, %s1574_s20 }
  0x31   : > { %p1335_p0 = por %p1334_p12, %p1333_p10 }
  0x32   : > { %p1331_p8 = pneg %p1330_p6 }
  0x33   : > { %p1337_p2 = por %p1336_p1, %p1335_p0 }
  0x35   : > { %p1338_p13 = pnand %p1337_p2, %p1331_p8 }
  0x37   : > { %1341 = shalt.err (!%p1338_p13)
}
  0x38   : > { %s1342_s16 = scalar_lea.vmem %s1578_s9, 1024  ;;  %s1416_s30 = smov [#allocation5]  }
  0x39   : > { %p1343_p3 = scmp.ne.s32.totalorder %s1578_s9, %s1342_s16  ;;  %s1347_s23 = sshll.u32 %s1416_s30, 4  ;;  %s1348_s23 = int_to_ptr.vmem [resolvable:$false] %s1347_s23 }
  0x3a   : > { %s1349_s24 = scalar_lea.vmem %s1348_s23, 2048  ;;  %p1350_p7 = scmp.lt.s32.totalorder %s1578_s9, %s1348_s23 }
  0x3b   : > { %p1345_p5 = pnand %p1343_p3, %p1299_p11  ;;  %p1351_p10 = scmp.lt.s32.totalorder %s1349_s24, %s1342_s16 }
  0x3d   : > { %p1346_p6 = pneg %p1345_p5  ;;  %p1352_p12 = por %p1351_p10, %p1350_p7 }
  0x3f   : > { %p1353_p0 = pnand %p1352_p12, %p1346_p6 }
  0x41   : > { %1356 = shalt.err (!%p1353_p0)
}
  0x42   : > { %s1733_s21 = smov 64   ;;  %339 = sbr.rel (%p1565_p4) target bundleno = 514 (0x202), region = 40 }
  0x43   : > { %1215 = dma.hbm_to_vmem [thread:$0]  (!%p1526_p9), %s1574_s20, 1024, %s1578_s9, %s317_s19, %s1733_s21, %s1733_s21, %s1415_s10  }
  0x44   : > { %s341_s17 = sand.u32 (!%p1565_p4), 1, %s1395_s25   ;;  %p1734_p7 = scmp.ne.s32.totalorder (!%p1565_p4), %s1730_s12, 0 }
  0x45   : > { %s1083_s15 = sshll.u32 (!%p1565_p4), %s341_s17, 6  ;;  %s342_s18 = scalar_lea.sflag (!%p1565_p4), [#allocation4], %s341_s17 }
  0x46   : > { %s1612_s16 = scalar_lea.vmem (!%p1565_p4), [#allocation3], %s1083_s15 }
  0x49   : > { %1382 = dma.done.wait (%p1734_p7), %s342_s18, 1024  }
  0x4a   : > { %1384 = vsyncadd (%p1734_p7), %s342_s18, 4294966272  ;;  %s351_s14 = scalar_lea.sflag [#allocation6], %s341_s17  ;;  %s1618_s22 = scalar_lea.vmem [#allocation5], %s1083_s15 }
  0x4b   : > { %1386 = dma.done.wait (%p1734_p7), %s351_s14, 1024  }
  0x4c   : > { %1388 = vsyncadd (%p1734_p7), %s351_s14, 4294966272  ;;  %v1417_v0 = vmov 0.0   ;;  %vm1418_vm0 = vmmov 0   ;;  %v1269_v1 = vld [vmem:[%s1612_s16] sm:$0xff]   ;;  %v1270_v2 = vld [vmem:[%s1612_s16 + $0x8] sm:$0xff]   ;;  %p428_p9 = scmp.lt.s32.totalorder %s1403_s27, 2  ;;  %v495_v22 = vlaneseq }
  0x4d   : > { %1145 = vmatprep.subr.bf16.mxu0 %v1417_v0  ;;  %1165 = vmatprep.subr.bf16.mxu1 %v1417_v0  ;;  %v1271_v3 = vld [vmem:[%s1612_s16 + $0x10] sm:$0xff]   ;;  %v1272_v4 = vld [vmem:[%s1612_s16 + $0x18] sm:$0xff]   ;;  %v1273_v5 = vld [vmem:[%s1612_s16 + $0x20] sm:$0xff]  }
  0x4e   : > { %1161 = vmatprep.mubr.msk.bf16.mxu0 %vm1418_vm0, %v1417_v0  ;;  %1181 = vmatprep.mubr.msk.bf16.mxu1 %vm1418_vm0, %v1417_v0  ;;  %s1743_s27 = smov (!%p428_p9, %s1403_s27), 2  ;;  %v1274_v6 = vld [vmem:[%s1612_s16 + $0x28] sm:$0xff]   ;;  %v1275_v7 = vld [vmem:[%s1612_s16 + $0x30] sm:$0xff]   ;;  %v1276_v8 = vld [vmem:[%s1612_s16 + $0x38] sm:$0xff]   ;;  %v496_v23 = vshrl.u32 %v495_v22, 7 }
  0x4f   : > { %1146 = vmatpush3.bf16.msra.mxu0 %v1269_v1  ;;  %1166 = vmatpush3.bf16.msra.mxu1 %v1269_v1  ;;  %s1651_s12 = sshll.u32 %s1743_s27, 4  ;;  %s439_s30 = scalar_lea.vmem %s1720_s1, %s1743_s27  ;;  %v1277_v14 = vld [vmem:[%s1618_s22] sm:$0xff]   ;;  %v1278_v15 = vld [vmem:[%s1618_s22 + $0x8] sm:$0xff]   ;;  %v1279_v16 = vld [vmem:[%s1618_s22 + $0x10] sm:$0xff]  }
  0x50   : > { %1147 = vmatprep.subr.bf16.mxu0 %v1417_v0  ;;  %1167 = vmatprep.subr.bf16.mxu1 %v1417_v0  ;;  %s435_s20 = scalar_lea.vmem %s1719_s0, %s1651_s12  ;;  %v593_v11 = vld [vmem:[%s439_s30] sm:$0x1]  ;;  %v1281_v18 = vld [vmem:[%s1618_s22 + $0x20] sm:$0xff]   ;;  %v1282_v19 = vld [vmem:[%s1618_s22 + $0x28] sm:$0xff]   ;;  %s442_s21 = scalar_lea.vmem %s1722_s3, %s1743_s27  ;;  %v497_v24 = vsub.s32 0, %v496_v23  ;;  %vm641_vm1 = vcmp.lt.s32.totalorder %v496_v23, 1 }
  0x51   : > { %v474_v9 = vld [vmem:[%s435_s20] sm:$0xff]  ;;  %v475_v10 = vld [vmem:[%s435_s20 + $0x8] sm:$0xff]  ;;  %v594_v13 = vpack.c.bf16 %v593_v11, %v593_v11  ;;  %v1283_v20 = vld [vmem:[%s1618_s22 + $0x30] sm:$0xff]   ;;  %s451_s18 = scalar_lea.vmem %s1724_s5, %s1651_s12  ;;  %vm645_vm2 = vcmp.eq.s32.totalorder %v496_v23, 0  ;;  %s471_s14 = scalar_lea.vmem %s1726_s7, %s1651_s12 }
  0x52   : > { %v476_v12 = vpack.c.bf16 %v475_v10, %v474_v9  ;;  %v1280_v17 = vld [vmem:[%s1618_s22 + $0x18] sm:$0xff]   ;;  %s461_s11 = scalar_lea.vmem %s1725_s6, %s1651_s12 }
  0x53   : > { %1148 = vmatpush3.bf16.msra.mxu0 %v1270_v2  ;;  %1168 = vmatpush3.bf16.msra.mxu1 %v1270_v2  ;;  %v1284_v21 = vld [vmem:[%s1618_s22 + $0x38] sm:$0xff]  }
  0x54   : > { %1149 = vmatprep.subr.bf16.mxu0 %v1417_v0  ;;  %1169 = vmatprep.subr.bf16.mxu1 %v1417_v0  ;;  %v493_v25 = vld [vmem:[%s442_s21] sm:$0x1] }
  0x55   : > { %v498_v26 = vrot.slane %v493_v25, %v497_v24 }
  0x57   : > { %1150 = vmatpush3.bf16.msra.mxu0 %v1271_v3  ;;  %1170 = vmatpush3.bf16.msra.mxu1 %v1271_v3 }
  0x58   : > { %1151 = vmatprep.subr.bf16.mxu0 %v1417_v0  ;;  %1171 = vmatprep.subr.bf16.mxu1 %v1417_v0 }
  0x5b   : > { %1152 = vmatpush3.bf16.msra.mxu0 %v1272_v4  ;;  %1172 = vmatpush3.bf16.msra.mxu1 %v1272_v4 }
  0x5c   : > { %1153 = vmatprep.subr.bf16.mxu0 %v1417_v0  ;;  %1173 = vmatprep.subr.bf16.mxu1 %v1417_v0 }
  0x5f   : > { %1154 = vmatpush3.bf16.msra.mxu0 %v1273_v5  ;;  %1174 = vmatpush3.bf16.msra.mxu1 %v1273_v5 }
  0x60   : > { %1155 = vmatprep.subr.bf16.mxu0 %v1417_v0  ;;  %1175 = vmatprep.subr.bf16.mxu1 %v1417_v0 }
  0x63   : > { %1156 = vmatpush3.bf16.msra.mxu0 %v1274_v6  ;;  %1176 = vmatpush3.bf16.msra.mxu1 %v1274_v6 }
  0x64   : > { %1157 = vmatprep.subr.bf16.mxu0 %v1417_v0  ;;  %1177 = vmatprep.subr.bf16.mxu1 %v1417_v0 }
  0x67   : > { %1158 = vmatpush3.bf16.msra.mxu0 %v1275_v7  ;;  %1178 = vmatpush3.bf16.msra.mxu1 %v1275_v7 }
  0x68   : > { %1159 = vmatprep.subr.bf16.mxu0 %v1417_v0  ;;  %1179 = vmatprep.subr.bf16.mxu1 %v1417_v0 }
  0x6b   : > { %1160 = vmatpush3.bf16.msra.mxu0 %v1276_v8  ;;  %1180 = vmatpush3.bf16.msra.mxu1 %v1276_v8 }
  0x6c   : > { %1185 = vmatprep.subr.bf16.mxu0 %v1417_v0 }
  0x6e   : > { %1162 = vmatmul.mubr.bf16.vlgmr.msra.gmra.mrb[0].mxu0 %v476_v12  ;;  %1182 = vmatmul.mubr.bf16.vlgmr.msra.gmra.mrb[0].mxu1 %v594_v13 }
  0x6f   : > { %1186 = vmatpush3.bf16.msra.mxu0 %v1277_v14  ;;  %1201 = vmatprep.mubr.msk.bf16.mxu0 %vm1418_vm0, %v1417_v0 }
  0x70   : > { %1187 = vmatprep.subr.bf16.mxu0 %v1417_v0 }
  0x73   : > { %1188 = vmatpush3.bf16.msra.mxu0 %v1278_v15 }
  0x74   : > { %1189 = vmatprep.subr.bf16.mxu0 %v1417_v0 }
  0x77   : > { %1190 = vmatpush3.bf16.msra.mxu0 %v1279_v16 }
  0x78   : > { %1191 = vmatprep.subr.bf16.mxu0 %v1417_v0 }
  0x7b   : > { %1192 = vmatpush3.bf16.msra.mxu0 %v1280_v17 }
  0x7c   : > { %1193 = vmatprep.subr.bf16.mxu0 %v1417_v0 }
  0x7f   : > { %1194 = vmatpush3.bf16.msra.mxu0 %v1281_v18 }
  0x80   : > { %1195 = vmatprep.subr.bf16.mxu0 %v1417_v0 }
  0x83   : > { %1196 = vmatpush3.bf16.msra.mxu0 %v1282_v19 }
  0x84   : > { %1197 = vmatprep.subr.bf16.mxu0 %v1417_v0 }
  0x87   : > { %1198 = vmatpush3.bf16.msra.mxu0 %v1283_v20 }
  0x88   : > { %1199 = vmatprep.subr.bf16.mxu0 %v1417_v0 }
  0x8b   : > { %1200 = vmatpush3.bf16.msra.mxu0 %v1284_v21 }
  0x8e   : > { %1202 = vmatmul.mubr.bf16.vlgmr.msra.gmra.mrb[4].mxu0 %v476_v12 }
 0x141   : > { %v582_v27 = vpop.f32.mrb[0].mxu0  ;;  %v629_v28 = vpop.f32.mrb[0].mxu1 }
 0x142   : > { %v583_v29 = vadd.f32 %v582_v27, %v498_v26  ;;  %v630_v30 = vadd.f32 %v629_v28, %v493_v25  ;;  %v1163_v31 = vpop.f32.mrb[1].mxu0  ;;  %v1183_v32 = vpop.f32.mrb[1].mxu1 }
 0x143   : > { %v585_v33 = vpop.f32.mrb[2].mxu0  ;;  %v632_v34 = vpop.f32.mrb[2].mxu1 }
 0x144   : > { %710 = vst [vmem:[%s451_s18] sm:$0xff] %v583_v29  ;;  %635 = vst [vmem:[#allocation2] sm:$0x1] %v630_v30  ;;  %v586_v35 = vadd.f32 %v585_v33, %v498_v26  ;;  %v1164_v36 = vpop.f32.mrb[3].mxu0  ;;  %v1184_v37 = vpop.f32.mrb[3].mxu1  ;;  %v662_v38 = vmul.f32 %v583_v29, %v583_v29  ;;  %v637_v39 = vrot.slane %v583_v29, 7 }
 0x146   : > { %711 = vst [vmem:[%s451_s18 + $0x8] sm:$0xff] %v586_v35  ;;  %664 = vadd.xlane.f32.xlu0 %v662_v38  ;;  %v663_v40 = vmul.f32 %v586_v35, %v586_v35  ;;  %v638_v41 = vrot.slane %v586_v35, 7 }
 0x148   : > { %v643_v42 = vsel %vm641_vm1, %v638_v41, %v637_v39  ;;  %v642_v43 = vsel %vm641_vm1, %v637_v39, %v638_v41 }
 0x149   : > { %v657_v44 = vmul.f32 %v642_v43, %v586_v35  ;;  %v683_v49 = vmul.f32 %v642_v43, %v642_v43 }
 0x14a   : > { %666 = vadd.xlane.f32.xlu0 %v663_v40 }
 0x14b   : > { %v1101_v45 = vld [vmem:[#allocation2] ss:$0 sm:$0xff] }
 0x14c   : > { %v653_v46 = vsel %vm645_vm2, %v1101_v45, %v643_v42  ;;  %655 = vst [vmem:[#allocation2 - $0x7] sm:$0x80] %v586_v35 }
 0x14d   : > { %v682_v47 = vmul.f32 %v653_v46, %v653_v46  ;;  %v656_v48 = vmul.f32 %v653_v46, %v583_v29 }
 0x14f   : > { %684 = vadd.xlane.f32.xlu1 %v682_v47  ;;  %658 = vadd.xlane.f32.xlu0 %v656_v48 }
 0x153   : > { %686 = vadd.xlane.f32.xlu1 %v683_v49 }
 0x157   : > { %660 = vadd.xlane.f32.xlu1 %v657_v44 }
 0x161   : > { %v812_v50 = vpop.f32.mrb[4].mxu0 }
 0x162   : > { %v1203_v51 = vpop.f32.mrb[5].mxu0  ;;  %819 = vst [vmem:[%s471_s14] sm:$0xff] %v812_v50 }
 0x163   : > { %v815_v52 = vpop.f32.mrb[6].mxu0 }
 0x164   : > { %v1204_v53 = vpop.f32.mrb[7].mxu0  ;;  %820 = vst [vmem:[%s471_s14 + $0x8] sm:$0xff] %v815_v52 }
 0x1d3   : > { %v665_v54 = vpop.xlane.xlu0 %664 }
 0x1d4   : > { %1285 = vrsqrt.f32 %v665_v54  ;;  %vm670_vm3 = vcmp.eq.f32.partialorder %v665_v54, inf  ;;  %v673_v1 = vand.u32 2147483648, %v665_v54  ;;  %vm672_vm5 = vcmp.eq.f32.partialorder %v665_v54, 0.0 }
 0x1d7   : > { %v667_v55 = vpop.xlane.xlu0 %666 }
 0x1d8   : > { %1287 = vrsqrt.f32 %v667_v55  ;;  %vm677_vm7 = vcmp.eq.f32.partialorder %v667_v55, inf  ;;  %v680_v10 = vand.u32 2147483648, %v667_v55  ;;  %vm679_vm9 = vcmp.eq.f32.partialorder %v667_v55, 0.0 }
 0x1dc   : > { %v685_v56 = vpop.xlane.xlu1 %684  ;;  %v659_v19 = vpop.xlane.xlu0 %658 }
 0x1dd   : > { %1289 = vrsqrt.f32 %v685_v56  ;;  %vm690_vm4 = vcmp.eq.f32.partialorder %v685_v56, inf  ;;  %v693_v2 = vand.u32 2147483648, %v685_v56  ;;  %vm692_vm6 = vcmp.eq.f32.partialorder %v685_v56, 0.0 }
 0x1de   : > { %v1286_v58 = vpop.eup %1285 }
 0x1df   : > { %v669_v59 = vmul.f32 %v1286_v58, %v665_v54 }
 0x1e0   : > { %v687_v57 = vpop.xlane.xlu1 %686 }
 0x1e1   : > { %1291 = vrsqrt.f32 %v687_v57  ;;  %v671_v62 = vsel %vm670_vm3, %v665_v54, %v669_v59  ;;  %vm697_vm8 = vcmp.eq.f32.partialorder %v687_v57, inf  ;;  %v700_v11 = vand.u32 2147483648, %v687_v57 }
 0x1e2   : > { %v1288_v60 = vpop.eup %1287  ;;  %v674_v5 = vsel %vm672_vm5, %v673_v1, %v671_v62  ;;  %vm699_vm10 = vcmp.eq.f32.partialorder %v687_v57, 0.0 }
 0x1e3   : > { %v676_v63 = vmul.f32 %v1288_v60, %v667_v55 }
 0x1e4   : > { %v661_v22 = vpop.xlane.xlu1 %660 }
 0x1e5   : > { %v678_v7 = vsel %vm677_vm7, %v667_v55, %v676_v63 }
 0x1e6   : > { %v681_v14 = vsel %vm679_vm9, %v680_v10, %v678_v7 }
 0x1e7   : > { %v1290_v61 = vpop.eup %1289 }
 0x1e8   : > { %v689_v0 = vmul.f32 %v1290_v61, %v685_v56 }
 0x1ea   : > { %v691_v3 = vsel %vm690_vm4, %v685_v56, %v689_v0 }
 0x1eb   : > { %v1292_v4 = vpop.eup %1291  ;;  %v694_v6 = vsel %vm692_vm6, %v693_v2, %v691_v3 }
 0x1ec   : > { %v702_v8 = vmul.f32 %v694_v6, %v674_v5  ;;  %v696_v9 = vmul.f32 %v1292_v4, %v687_v57 }
 0x1ee   : > { %v704_v12 = vmax.f32 %v702_v8, 1e-06  ;;  %v698_v13 = vsel %vm697_vm8, %v687_v57, %v696_v9 }
 0x1ef   : > { %v701_v15 = vsel %vm699_vm10, %v700_v11, %v698_v13 }
 0x1f0   : > { %1293 = vrcp.f32 %v704_v12  ;;  %v703_v16 = vmul.f32 %v701_v15, %v681_v14 }
 0x1f2   : > { %v705_v17 = vmax.f32 %v703_v16, 1e-06 }
 0x1f4   : > { %1295 = vrcp.f32 %v705_v17 }
 0x1fa   : > { %v1294_v18 = vpop.eup %1293 }
 0x1fb   : > { %v707_v20 = vmul.f32 %v1294_v18, %v659_v19 }
 0x1fd   : > { %712 = vst [vmem:[%s461_s11] sm:$0xff] %v707_v20 }
 0x1fe   : > { %v1296_v21 = vpop.eup %1295 }
 0x1ff   : > { %v709_v23 = vmul.f32 %v1296_v21, %v661_v22 }
 0x201   : > { %713 = vst [vmem:[%s461_s11 + $0x8] sm:$0xff] %v709_v23 }
 0x202 PF: > { %s24_s29 = sadd.s32 1, %s1411_s29   ;;  %s1735_s24 = smov %s1395_s25 }
 0x203   : > { %p21_p11 = scmp.ge.s32.totalorder %s24_s29, 5   ;;  %s1736_s25 = smov %s1399_s26 }
 0x204   : > { %s1737_s26 = smov %s1508_s13  ;;  %s1738_s27 = smov %s1407_s28 }
 0x205   : > { %s1739_s28 = smov %s1741_s8  ;;  %23 = sbr.rel (!%p21_p11) target bundleno = 6 (0x6), region = 130 }
 0x20c   :  { %901 = vsyncpa [#allocation4], 1 }
 0x20d   :  { %903 = vsyncpa [#allocation4 + $0x1], 1 }
 0x20e   :  { %904 = vsyncpa [#allocation6], 1 }
 0x20f   :  { %906 = vsyncpa [#allocation6 + $0x1], 1 }

</bundles_post_ra>
